<compile_context>
chip_gen: v5e
topology: v5e:2x2
jax: 0.10.0
libtpu: 0.0.40
codegen_flags: <defaults>
</compile_context>

<pallas_src>
import jax
import jax.numpy as jnp
from jax.experimental import pallas as pl
from jax.experimental.pallas import tpu as pltpu


# --------------------------------------------------------------------------
# Kernel
# --------------------------------------------------------------------------
def proj_block_kernel(x_ref, mods_ref, w_ref, b_ref, o_ref):
    # x_ref:    (1, TM, H)   token tile of one batch element (activation dtype)
    # mods_ref: (1, 2, H)    f32 adaLN [shift; scale] for this batch element
    # w_ref:    (H, TN)      output-linear weight slab (MXU dtype, e.g. bf16)
    # b_ref:    (1, TN)      f32 output-linear bias slab
    # o_ref:    (1, TM, TN)  output tile

    # --- LayerNorm (no affine, eps=1e-6) over hidden dim, stats in f32 ---
    x = x_ref[0].astype(jnp.float32)                      # (TM, H)
    mean = jnp.mean(x, axis=-1, keepdims=True)            # (TM, 1)
    xc = x - mean
    var = jnp.mean(xc * xc, axis=-1, keepdims=True)       # (TM, 1)
    xn = xc * jax.lax.rsqrt(var + 1e-6)                   # rsqrt -> EUP

    # --- modulate: x * (1 + scale) + shift (broadcast over tokens), f32 ---
    m = mods_ref[0]                                        # (2, H) f32
    shift = m[0:1, :]                                      # (1, H)
    scale = m[1:2, :]                                      # (1, H)
    mod = xn * (1.0 + scale) + shift                       # (TM, H) f32

    # --- final projection: MXU operands in weight dtype, f32 accumulate ---
    mod = mod.astype(w_ref.dtype)
    out = jnp.dot(mod, w_ref[...], preferred_element_type=jnp.float32)
    out = out + b_ref[...]                                 # (TM, TN) f32 bias

    o_ref[0] = out.astype(o_ref.dtype)


# --------------------------------------------------------------------------
# Tile / VMEM-budget selection
# --------------------------------------------------------------------------
def _vmem_working_set(tm, tn, H, x_item, w_item, o_item):
    """Rough VMEM bytes for one grid step (double-buffered DMA + temporaries)."""
    buf = 2 * tm * H * x_item          # x tile (double buffered)
    buf += 2 * H * tn * w_item         # weight slab (double buffered)
    buf += 2 * tm * tn * o_item        # output tile (double buffered)
    buf += 2 * (2 * H * 4 + tn * 4)    # mods + bias (f32, tiny)
    # in-kernel temporaries: f32 x, f32 mod, cast mod, f32 accumulator
    tmp = tm * H * (4 + 4 + w_item) + tm * tn * 4
    return buf + tmp


def _pick_tiles(T, H, C_pad, x_item, w_item, o_item, budget, tm_target, max_tn):
    if T <= tm_target:
        tm_cands = [T]
    else:
        tm_cands = [t for t in (512, 256, 128) if t <= tm_target] or [128]
    # Prefer full-C residency (weight loaded once), then the largest tm.
    tn_cands = [C_pad] + [t for t in (2048, 1024, 512, 256, 128) if t < C_pad]
    if max_tn is not None:
        tn_cands = [t for t in tn_cands if t <= max_tn] or [128]
    for tn in tn_cands:
        for tm in tm_cands:
            if _vmem_working_set(tm, tn, H, x_item, w_item, o_item) <= budget:
                return tm, tn
    return tm_cands[-1], tn_cands[-1]


def _vmem_capacity_bytes():
    try:
        info = pltpu.get_tpu_info()
        cap = int(getattr(info, "vmem_capacity_bytes", 0))
        if cap > 0:
            return cap
    except Exception:
        pass
    return 64 * 1024 * 1024  # conservative (v7x-sized) fallback


# --------------------------------------------------------------------------
# Wrapper
# --------------------------------------------------------------------------
def proj_block(x, c, w_ada, b_ada, w_lin, b_lin, *,
               mxu_dtype=jnp.bfloat16, tm_target=512, max_tn=None):
    """ProjBlock forward.

    x: (B, T, H) activations, c: (B, H) conditioning.
    Weights are stored so that y = inp @ W + b:
      w_ada: (H, 2H), b_ada: (2H,), w_lin: (H, C), b_lin: (C,).
    mxu_dtype: dtype of the MXU operands for the output projection
      (bf16 by default; pass jnp.float32 for exact-precision matmul).
    """
    B, T, H = x.shape
    C = w_lin.shape[1]
    assert w_ada.shape == (H, 2 * H)

    # --- adaLN branch hoisted out of the kernel (tiny (B,H)@(H,2H) GEMM) ---
    c32 = c.astype(jnp.float32)
    silu_c = c32 * jax.nn.sigmoid(c32)
    ada = silu_c @ w_ada.astype(jnp.float32) + b_ada.astype(jnp.float32)
    # Keep shift/scale in f32, packed as one (B, 2, H) array: [shift; scale].
    mods = jnp.stack([ada[:, :H], ada[:, H:]], axis=1)     # (B, 2, H) f32

    # --- lane-dense output: pad C up to a multiple of 128 ---
    C_pad = ((C + 127) // 128) * 128
    w = w_lin.astype(mxu_dtype)
    b = b_lin.astype(jnp.float32)
    if C_pad != C:
        w = jnp.pad(w, ((0, 0), (0, C_pad - C)))
        b = jnp.pad(b, ((0, C_pad - C),))
    b2d = b.reshape(1, C_pad)

    x_item = int(jnp.dtype(x.dtype).itemsize)
    w_item = int(jnp.dtype(mxu_dtype).itemsize)
    o_item = x_item

    # --- per-generation VMEM budget (v7x: 64 MiB physical; v5e/v6e: 128) ---
    phys = _vmem_capacity_bytes()
    budget = int(phys * 0.6)
    tm, tn = _pick_tiles(T, H, C_pad, x_item, w_item, o_item,
                         budget, tm_target, max_tn)
    ws = _vmem_working_set(tm, tn, H, x_item, w_item, o_item)
    vmem_limit = int(min(max(2 * ws + (16 << 20), 32 << 20), int(phys * 0.85)))

    nw = pl.cdiv(C_pad, tn)          # weight-column tiles (1 => fully resident)
    mt = pl.cdiv(T, tm)              # token tiles
    grid = (nw, B, mt)               # n slowest -> weight resident across (b, m)

    # --- HBM traffic estimate for *this* layout (weight fetched nw times,
    #     x re-streamed once per weight-column tile) ---
    cost = pl.CostEstimate(
        flops=2 * B * T * H * C_pad,
        transcendentals=B * T * nw,          # one rsqrt per token row per n step
        bytes_accessed=int(nw * B * T * H * x_item        # x (re)streamed
                           + H * C_pad * w_item           # weight, ~once
                           + B * T * C_pad * o_item       # output written
                           + B * 2 * H * 4 + C_pad * 4),  # mods + bias
    )

    out = pl.pallas_call(
        proj_block_kernel,
        out_shape=jax.ShapeDtypeStruct((B, T, C_pad), x.dtype),
        grid_spec=pltpu.PrefetchScalarGridSpec(
            num_scalar_prefetch=0,
            grid=grid,
            in_specs=[
                pl.BlockSpec((1, tm, H), lambda n, b, m: (b, m, 0)),   # x tile
                pl.BlockSpec((1, 2, H), lambda n, b, m: (b, 0, 0)),    # shift/scale
                pl.BlockSpec((H, tn), lambda n, b, m: (0, n)),         # weight slab
                pl.BlockSpec((1, tn), lambda n, b, m: (0, n)),         # bias slab
            ],
            out_specs=pl.BlockSpec((1, tm, tn), lambda n, b, m: (b, m, n)),
        ),
        compiler_params=pltpu.CompilerParams(
            dimension_semantics=("arbitrary", "parallel", "parallel"),
            vmem_limit_bytes=vmem_limit,
        ),
        cost_estimate=cost,
    )(x, mods, w, b2d)

    if C_pad != C:
        out = out[..., :C]
    return out


# --------------------------------------------------------------------------
# Pure-JAX reference (matches the PyTorch forward)
# --------------------------------------------------------------------------
def proj_block_reference(x, c, w_ada, b_ada, w_lin, b_lin, mxu_dtype=None):
    """If mxu_dtype is given, emulate the kernel's MXU-operand cast."""
    c32 = c.astype(jnp.float32)
    silu_c = c32 * jax.nn.sigmoid(c32)
    ada = silu_c @ w_ada.astype(jnp.float32) + b_ada.astype(jnp.float32)
    H = x.shape[-1]
    shift, scale = ada[:, :H], ada[:, H:]
    x32 = x.astype(jnp.float32)
    mean = jnp.mean(x32, axis=-1, keepdims=True)
    var = jnp.mean((x32 - mean) ** 2, axis=-1, keepdims=True)
    xn = (x32 - mean) * jax.lax.rsqrt(var + 1e-6)
    mod = xn * (1.0 + scale[:, None, :]) + shift[:, None, :]
    if mxu_dtype is not None:
        mod = mod.astype(mxu_dtype)
        w = w_lin.astype(mxu_dtype)
    else:
        w = w_lin.astype(jnp.float32)
    out = jnp.einsum("bth,hc->btc", mod, w,
                     preferred_element_type=jnp.float32)
    out = out + b_lin.astype(jnp.float32)
    return out.astype(x.dtype)


def _make_inputs(key, B, T, H, C):
    k_x, k_c, k_wa, k_ba, k_wl, k_bl = jax.random.split(key, 6)
    x = jax.random.normal(k_x, (B, T, H), dtype=jnp.float32)
    c = jax.random.normal(k_c, (B, H), dtype=jnp.float32)
    w_ada = jax.random.normal(k_wa, (H, 2 * H), dtype=jnp.float32) / jnp.sqrt(H)
    b_ada = jax.random.normal(k_ba, (2 * H,), dtype=jnp.float32) * 0.01
    w_lin = jax.random.normal(k_wl, (H, C), dtype=jnp.float32) / jnp.sqrt(H)
    b_lin = jax.random.normal(k_bl, (C,), dtype=jnp.float32) * 0.01
    return x, c, w_ada, b_ada, w_lin, b_lin


if __name__ == "__main__":
    key = jax.random.PRNGKey(0)
    k_small, k_mid, k_big = jax.random.split(key, 3)

    # 1) Small shapes consistent with the module (batch=2, seq=8, hidden=32,
    #    out=16); exact f32 MXU path, tight tolerance.  Exercises C < 128
    #    (lane-dense pad-to-128 + slice).
    B, T, H, C = 2, 8, 32, 16
    args = _make_inputs(k_small, B, T, H, C)
    out = jax.block_until_ready(proj_block(*args, mxu_dtype=jnp.float32))
    ref = proj_block_reference(*args)
    assert out.shape == (B, T, C)
    assert jnp.allclose(out, ref, atol=1e-4, rtol=1e-4), "mismatch (small, f32)"

    # 2) Weight-resident path (single n block), default bf16 MXU operands.
    B2, T2, H2, C2 = 2, 512, 256, 256
    args2 = _make_inputs(k_mid, B2, T2, H2, C2)
    out2 = jax.block_until_ready(proj_block(*args2))
    ref2 = proj_block_reference(*args2, mxu_dtype=jnp.bfloat16)
    assert out2.shape == (B2, T2, C2)
    assert jnp.allclose(out2, ref2, atol=1e-2, rtol=1e-2), "mismatch (resident, bf16)"

    # 3) Forced multi-block tiling on every grid axis (weight slab held
    #    resident across the batch/token sweep, streamed only per n).
    B3, T3, H3, C3 = 2, 1024, 256, 384
    args3 = _make_inputs(k_big, B3, T3, H3, C3)
    out3 = jax.block_until_ready(proj_block(*args3, tm_target=256, max_tn=128))
    ref3 = proj_block_reference(*args3, mxu_dtype=jnp.bfloat16)
    assert out3.shape == (B3, T3, C3)
    assert jnp.allclose(out3, ref3, atol=1e-2, rtol=1e-2), "mismatch (tiled, bf16)"

    print("KERNEL_OK")
</pallas_src>

<mosaic_0001>
module attributes {stable_mosaic.version = 11 : i64} {
  func.func @proj_block_kernel(%arg0: i32, %arg1: i32, %arg2: i32, %arg3: memref<1x8x32xf32, #tpu.memory_space<vmem>>, %arg4: memref<1x2x32xf32, #tpu.memory_space<vmem>>, %arg5: memref<32x128xf32, #tpu.memory_space<vmem>>, %arg6: memref<1x128xf32, #tpu.memory_space<vmem>>, %arg7: memref<1x8x128xf32, #tpu.memory_space<vmem>>) attributes {dimension_semantics = [#tpu.dimension_semantics<arbitrary>, #tpu.dimension_semantics<parallel>, #tpu.dimension_semantics<parallel>], iteration_bounds = array<i64: 1, 2, 1>, scalar_prefetch = 0 : i64, scratch_operands = 0 : i64, tpu.core_type = #tpu.core_type<tc>, window_params = [{transform_indices = @transform_0, window_bounds = array<i64: 1, 8, 32>}, {transform_indices = @transform_1, window_bounds = array<i64: 1, 2, 32>}, {transform_indices = @transform_2, window_bounds = array<i64: 32, 128>}, {transform_indices = @transform_3, window_bounds = array<i64: 1, 128>}, {transform_indices = @transform_4, window_bounds = array<i64: 1, 8, 128>}]} {
    %c0 = arith.constant 0 : index
    %c0_0 = arith.constant 0 : index
    %c0_1 = arith.constant 0 : index
    %0 = vector.load %arg3[%c0, %c0_0, %c0_1] : memref<1x8x32xf32, #tpu.memory_space<vmem>>, vector<1x8x32xf32>
    %1 = vector.shape_cast %0 : vector<1x8x32xf32> to vector<8x32xf32>
    %cst = arith.constant dense<0.000000e+00> : vector<8xf32>
    %2 = vector.multi_reduction <add>, %1, %cst [1] : vector<8x32xf32> to vector<8xf32>
    %3 = vector.shape_cast %2 : vector<8xf32> to vector<8x1xf32>
    %cst_2 = arith.constant 3.200000e+01 : f32
    %4 = vector.broadcast %cst_2 : f32 to vector<8x1xf32>
    %5 = arith.divf %3, %4 : vector<8x1xf32>
    %6 = vector.broadcast %5 : vector<8x1xf32> to vector<8x32xf32>
    %7 = arith.subf %1, %6 : vector<8x32xf32>
    %8 = arith.mulf %7, %7 : vector<8x32xf32>
    %cst_3 = arith.constant dense<0.000000e+00> : vector<8xf32>
    %9 = vector.multi_reduction <add>, %8, %cst_3 [1] : vector<8x32xf32> to vector<8xf32>
    %10 = vector.shape_cast %9 : vector<8xf32> to vector<8x1xf32>
    %cst_4 = arith.constant 3.200000e+01 : f32
    %11 = vector.broadcast %cst_4 : f32 to vector<8x1xf32>
    %12 = arith.divf %10, %11 : vector<8x1xf32>
    %cst_5 = arith.constant 9.99999997E-7 : f32
    %13 = vector.broadcast %cst_5 : f32 to vector<8x1xf32>
    %14 = arith.addf %12, %13 : vector<8x1xf32>
    %15 = math.rsqrt %14 : vector<8x1xf32>
    %16 = vector.broadcast %15 : vector<8x1xf32> to vector<8x32xf32>
    %17 = arith.mulf %7, %16 : vector<8x32xf32>
    %c0_6 = arith.constant 0 : index
    %c0_7 = arith.constant 0 : index
    %c0_8 = arith.constant 0 : index
    %18 = vector.load %arg4[%c0_6, %c0_7, %c0_8] : memref<1x2x32xf32, #tpu.memory_space<vmem>>, vector<1x2x32xf32>
    %19 = vector.shape_cast %18 : vector<1x2x32xf32> to vector<2x32xf32>
    %20 = vector.extract_strided_slice %19 {offsets = [0, 0], sizes = [1, 32], strides = [1, 1]} : vector<2x32xf32> to vector<1x32xf32>
    %21 = vector.extract_strided_slice %19 {offsets = [1, 0], sizes = [1, 32], strides = [1, 1]} : vector<2x32xf32> to vector<1x32xf32>
    %cst_9 = arith.constant 1.000000e+00 : f32
    %22 = vector.broadcast %cst_9 : f32 to vector<1x32xf32>
    %23 = arith.addf %22, %21 : vector<1x32xf32>
    %24 = vector.broadcast %23 : vector<1x32xf32> to vector<8x32xf32>
    %25 = arith.mulf %17, %24 : vector<8x32xf32>
    %26 = vector.broadcast %20 : vector<1x32xf32> to vector<8x32xf32>
    %27 = arith.addf %25, %26 : vector<8x32xf32>
    %c0_10 = arith.constant 0 : index
    %c0_11 = arith.constant 0 : index
    %28 = vector.load %arg5[%c0_10, %c0_11] : memref<32x128xf32, #tpu.memory_space<vmem>>, vector<32x128xf32>
    %cst_12 = arith.constant dense<0.000000e+00> : vector<8x128xf32>
    %29 = tpu.matmul %27, %28, %cst_12 {dimension_numbers = #tpu.dot_dimension_numbers<[1], [0], [0], [1], [0, 0, 1, 1], [], []>} : vector<8x32xf32>, vector<32x128xf32>, vector<8x128xf32> -> vector<8x128xf32>
    %c0_13 = arith.constant 0 : index
    %c0_14 = arith.constant 0 : index
    %30 = vector.load %arg6[%c0_13, %c0_14] : memref<1x128xf32, #tpu.memory_space<vmem>>, vector<1x128xf32>
    %31 = vector.broadcast %30 : vector<1x128xf32> to vector<8x128xf32>
    %32 = arith.addf %29, %31 : vector<8x128xf32>
    %c0_15 = arith.constant 0 : index
    %c0_16 = arith.constant 0 : index
    %c0_17 = arith.constant 0 : index
    %33 = vector.load %arg7[%c0_15, %c0_16, %c0_17] : memref<1x8x128xf32, #tpu.memory_space<vmem>>, vector<1x8x128xf32>
    %34 = vector.shape_cast %33 : vector<1x8x128xf32> to vector<8x128xf32>
    %35 = vector.shape_cast %32 : vector<8x128xf32> to vector<1x8x128xf32>
    tpu.vector_store %arg7[%c0_15, %c0_16, %c0_17], %35 {strides = array<i32>} : memref<1x8x128xf32, #tpu.memory_space<vmem>>, vector<1x8x128xf32>,
    return
  }
  func.func @transform_0(%arg0: i32, %arg1: i32, %arg2: i32) -> (i32, i32, i32) {
    %c0_i32 = arith.constant 0 : i32
    %c0_i32_0 = arith.constant 0 : i32
    return %arg1, %arg2, %c0_i32 : i32, i32, i32
  }
  func.func @transform_1(%arg0: i32, %arg1: i32, %arg2: i32) -> (i32, i32, i32) {
    %c0_i32 = arith.constant 0 : i32
    %c0_i32_0 = arith.constant 0 : i32
    %c0_i32_1 = arith.constant 0 : i32
    return %arg1, %c0_i32, %c0_i32_0 : i32, i32, i32
  }
  func.func @transform_2(%arg0: i32, %arg1: i32, %arg2: i32) -> (i32, i32) {
    %c0_i32 = arith.constant 0 : i32
    %c0_i32_0 = arith.constant 0 : i32
    return %c0_i32, %arg0 : i32, i32
  }
  func.func @transform_3(%arg0: i32, %arg1: i32, %arg2: i32) -> (i32, i32) {
    %c0_i32 = arith.constant 0 : i32
    %c0_i32_0 = arith.constant 0 : i32
    return %c0_i32, %arg0 : i32, i32
  }
  func.func @transform_4(%arg0: i32, %arg1: i32, %arg2: i32) -> (i32, i32, i32) {
    %c0_i32 = arith.constant 0 : i32
    return %arg1, %arg2, %arg0 : i32, i32, i32
  }
}

</mosaic_0001>

<bundles_post_ra>
// kernel: tpu_custom_call.1
= control target key start
LH: loop header
LB: loop body
LE: loop exit
PB: predicated region body
PF: predicated region fallthrough
CT: control target
= control target key end

     0   :  { %s1018_s0 = inlined_call_operand.hbm [shape: f32[2,8,32], index: 0, kind: input, shape index: {}]   ;;  %s1019_s1 = inlined_call_operand.hbm [shape: f32[2,2,32], index: 1, kind: input, shape index: {}]   ;;  %s1020_s2 = inlined_call_operand.hbm [shape: f32[32,128], index: 2, kind: input, shape index: {}]   ;;  %s1021_s3 = inlined_call_operand.vmem [shape: f32[1,128], index: 3, kind: input, shape index: {}]   ;;  %s1022_s4 = inlined_call_operand.hbm [shape: f32[2,8,128], index: 4, kind: output, shape index: {}]  }
   0x1   :  { %1027 = sst [smem:[#allocation18_spill]] %s1020_s2 }
   0x2   :  { %9 = vsyncpa [#allocation3], 0 }
   0x3   :  { %11 = vsyncpa [#allocation3 + $0x1], 0 }
   0x4   :  { %12 = vsyncpa [#allocation6], 0 }
   0x5   :  { %14 = vsyncpa [#allocation6 + $0x1], 0 }
   0x6   :  { %15 = vsyncpa [#allocation4], 0 }
   0x7   :  { %17 = vsyncpa [#allocation4 + $0x1], 0  ;;  %s851_s15 = smov 0   ;;  %s853_s16 = smov 0  }
   0x8   :  { %s855_s17 = smov 0   ;;  %s857_s18 = smov 0  }
   0x9   :  { %s859_s19 = smov 0   ;;  %s861_s20 = smov 0  }
   0xa LB: > { %1028 = sst [smem:[#allocation13_spill]] %s800_s15  ;;  %s882_s21 = sadd.s32 4294967295, %s820_s20   ;;  %s820_s20 = sphi %s861_s20, %s23_s20   ;;  %s816_s19 = sphi %s859_s19, %s1047_s19   ;;  %s812_s18 = sphi %s857_s18, %s1046_s18   ;;  %s808_s17 = sphi %s855_s17, %s1042_s17   ;;  %s804_s16 = sphi %s853_s16, %s1045_s16   ;;  %s800_s15 = sphi %s851_s15, %s1044_s15  }
   0xb   : > { %1029 = sst [smem:[#allocation14_spill]] %s808_s17  ;;  %p536_p0 = scmp.ge.s32.totalorder %s820_s20, 1 }
   0xc   : > { %p65_p1 = scmp.eq.s32.totalorder %s882_s21, 0  ;;  %p183_p2 = scmp.lt.s32.totalorder %s820_s20, 3 }
   0xd   : > { %s1030_s2 = sld [smem:[#allocation18_spill]]  ;;  %s822_s26 = smov [#allocation7]  }
   0xe   : > { %p890_p3 = pnand %p536_p0, %p183_p2  ;;  %s198_s27 = sshll.u32 %s822_s26, 4  ;;  %s199_s27 = int_to_ptr.vmem [resolvable:$true] %s198_s27 }
   0xf   : > { %p539_p6 = scmp.ge.s32.totalorder %s820_s20, 2  ;;  %s823_s28 = smov 128  }
  0x10   : > { %p564_p4 = pneg %p890_p3  ;;  %s824_s29 = smov 8  }
  0x11   : > { %s535_s30 = sadd.s32 4294967294, %s820_s20   ;;  %s38_s5 = sadd.s32 1, %s816_s19 }
  0x12   : > { %p565_p5 = pnand %p564_p4, %p65_p1  ;;  %s51_s6 = sadd.s32 1, %s808_s17 }
  0x13   : > { %s196_s24 = sshll.u32 %s1030_s2, 4  ;;  %p40_p7 = scmp.ge.s32.totalorder %s38_s5, 2  ;;  %s197_s24 = int_to_ptr.hbm [resolvable:$true] %s196_s24 }
  0x14   : > { %567 = dma.hbm_to_vmem [thread:$0]  (!%p565_p5), %s197_s24, 512, %s199_s27, [#allocation6], %s823_s28, %s823_s28, %s824_s29  }
  0x15   : > { %p58_p8 = scmp.ne.s32.totalorder %s808_s17, %s804_s16  ;;  %p59_p9 = scmp.eq.s32.totalorder %s820_s20, 0 }
  0x16   : > { %p64_p10 = scmp.ne.s32.totalorder %s804_s16, %s800_s15  ;;  %s1049_s5 = smov (%p40_p7, %s38_s5), 0 }
  0x17   : > { %1032 = sst [smem:[#allocation15_spill]] %s1049_s5  ;;  %p909_p11 = por %p59_p9, %p58_p8 }
  0x18   : > { %p915_p12 = por %p65_p1, %p64_p10  ;;  %s46_s9 = ssub.s32 %s816_s19, %s1049_s5 }
  0x19   : > { %p170_p13 = scmp.eq.s32.totalorder %s882_s21, 1  ;;  %p49_p0 = scmp.eq.s32.totalorder %s46_s9, 0 }
  0x1a   : > { %p176_p2 = scmp.eq.s32.totalorder %s535_s30, 1  ;;  %p580_p5 = scmp.lt.s32.totalorder %s820_s20, 2 }
  0x1b   : > { %p922_p4 = por %p170_p13, %p58_p8  ;;  %s218_s13 = sand.u32 1, %s808_s17  }
  0x1c   : > { %s928_s11 = scalar_select %p49_p0, %s808_s17, %s51_s6  }
  0x1d   : > { %p930_p7 = por %p176_p2, %p64_p10  ;;  %s540_s14 = sshll.u32 %s218_s13, 3 }
  0x1e   : > { %1036 = sst [smem:[#allocation16_spill]] %s928_s11  ;;  %s541_s22 = sshll.u32 %s816_s19, 3 }
  0x1f   : > { %s1037_s12 = scalar_select %p930_p7, 1, 0 }
  0x20   : > { %s227_s26 = scalar_lea.hbm %s1018_s0, %s541_s22  ;;  %s222_s27 = scalar_lea.vmem [#allocation2], %s540_s14 }
  0x21   : > { %1038 = sst [smem:[#allocation17_spill]] %s1037_s12  ;;  %s231_s28 = sshll.u32 %s222_s27, 4  ;;  %s232_s28 = int_to_ptr.vmem [resolvable:$true] %s231_s28 }
  0x22   : > { %s229_s29 = sshll.u32 %s227_s26, 4  ;;  %p569_p8 = pnand %p580_p5, %p909_p11  ;;  %s230_s29 = int_to_ptr.hbm [resolvable:$true] %s229_s29 }
  0x23   : > { %s238_s30 = sand.u32 1, %s820_s20   ;;  %s542_s6 = sshll.u32 %s218_s13, 1 }
  0x24   : > { %s219_s9 = scalar_lea.sflag [#allocation3], %s218_s13  ;;  %s543_s2 = sshll.u32 %s816_s19, 1 }
  0x25   : > { %571 = dma.hbm_to_vmem [thread:$0]  (!%p569_p8), %s230_s29, 128, %s232_s28, %s219_s9  }
  0x26   : > { %s246_s17 = scalar_lea.hbm %s1019_s1, %s543_s2  ;;  %s242_s12 = scalar_lea.vmem [#allocation5], %s542_s6 }
  0x27   : > { %s250_s15 = sshll.u32 %s242_s12, 4  ;;  %s248_s23 = sshll.u32 %s246_s17, 4  ;;  %s251_s15 = int_to_ptr.vmem [resolvable:$true] %s250_s15  ;;  %s249_s23 = int_to_ptr.hbm [resolvable:$true] %s248_s23 }
  0x28   : > { %s239_s14 = scalar_lea.sflag [#allocation6], %s238_s30  ;;  %259 = sbr.rel (%p890_p3) target bundleno = 451 (0x1c3), region = 36 }
  0x29   : > { %574 = dma.hbm_to_vmem [thread:$0]  (!%p569_p8), %s249_s23, 32, %s251_s15, %s239_s14  }
  0x2a   : > { %s949_s7 = sand.u32 (!%p890_p3), 1, %s804_s16  }
  0x2b   : > { %s545_s13 = sshll.u32 (!%p890_p3), %s949_s7, 3  ;;  %s262_s5 = scalar_lea.sflag (!%p890_p3), [#allocation3], %s949_s7 }
  0x2c   : > { %s265_s2 = scalar_lea.vmem (!%p890_p3), [#allocation2], %s545_s13 }
  0x2d   : > { %783 = dma.done.wait (%p915_p12), %s262_s5, 128  }
  0x2e   : > { %785 = vsyncadd (%p915_p12), %s262_s5, 4294967168  ;;  %s271_s15 = sand.u32 1, %s882_s21   ;;  %s546_s17 = sshll.u32 %s949_s7, 1 }
  0x2f   : > { %s272_s25 = scalar_lea.sflag [#allocation6], %s271_s15  ;;  %s961_s11 = scalar_lea.vmem [#allocation5], %s546_s17 }
  0x30   : > { %787 = dma.done.wait (%p915_p12), %s272_s25, 32  }
  0x31   : > { %789 = vsyncadd (%p915_p12), %s272_s25, 4294967264 }
  0x32   : > { %791 = dma.done.wait (%p65_p1), [#allocation6], 512  }
  0x33   : > { %793 = vsyncadd (%p65_p1), [#allocation6], 4294966784  ;;  %vm318_vm0 = vcmask 261120   ;;  %v317_v0 = vld [vmem:[%s265_s2] sm:$0xff]  ;;  %v825_v2 = vmov 32.0   ;;  %v354_v17 = vld [vmem:[#allocation7] sm:$0xff] }
  0x34   : > { %v319_v1 = vsel %vm318_vm0, %v317_v0, 0.0  ;;  %636 = vrcp.f32 %v825_v2  ;;  %v357_v14 = vld [vmem:[#allocation7 + $0x18] sm:$0xff]  ;;  %v356_v15 = vld [vmem:[#allocation7 + $0x10] sm:$0xff]  ;;  %v355_v16 = vld [vmem:[#allocation7 + $0x8] sm:$0xff]  ;;  %s551_s21 = sshll.u32 %s812_s18, 3  ;;  %s313_s27 = scalar_lea.vmem [#allocation8], %s545_s13 }
  0x35   : > { %320 = vadd.xlane.f32.xlu0 %v319_v1  ;;  %377 = vmatpush.msra.mxu0 %v357_v14  ;;  %v348_v24 = vld [vmem:[%s961_s11] sm:$0x3]  ;;  %s399_s22 = scalar_lea.hbm %s1022_s4, %s551_s21  ;;  %v635_v35 = vld [vmem:[%s1021_s3] ss:$0 sm:$0xff]  ;;  %s401_s28 = sshll.u32 %s313_s27, 4  ;;  %s402_s28 = int_to_ptr.vmem [resolvable:$true] %s401_s28 }
  0x36   : > { %v349_v26 = vadd.f32 1.0, %v348_v24  ;;  %v352_v32 = vperm.slane %v348_v24, 0  ;;  %s403_s29 = sshll.u32 %s399_s22, 4  ;;  %s387_s30 = scalar_lea.sflag [#allocation4], %s949_s7  ;;  %s404_s29 = int_to_ptr.hbm [resolvable:$true] %s403_s29 }
  0x37   : > { %378 = vmatpush.msra.mxu0 %v356_v15  ;;  %s744_s18 = sshra.s32 %s404_s29, 4  ;;  %s750_s14 = scalar_lea.hbm %s1022_s4, 16  ;;  %s745_s18 = int_to_ptr.hbm [resolvable:$true] %s744_s18 }
  0x38   : > { %v350_v29 = vperm.slane %v349_v26, 1  ;;  %s746_s6 = scalar_lea.hbm %s745_s18, 8  ;;  %p751_p10 = scmp.lt.s32.totalorder %s745_s18, %s1022_s4 }
  0x39   : > { %379 = vmatpush.msra.mxu0 %v355_v16  ;;  %p747_p1 = scmp.ne.s32.totalorder %s745_s18, %s746_s6  ;;  %p752_p11 = scmp.lt.s32.totalorder %s750_s14, %s746_s6 }
  0x3a   : > { %v637_v3 = vpop.eup %636 }
  0x3b   : > { %v323_v4 = vmul.f32 32.0, %v637_v3  ;;  %vm327_vm1 = vweird.f32 %v637_v3  ;;  %380 = vmatpush.msra.mxu0 %v354_v17  ;;  %p748_p3 = pnand %p747_p1, %p922_p4  ;;  %p753_p12 = por %p752_p11, %p751_p10 }
  0x3d   : > { %v324_v5 = vsub.f32 1.0, %v323_v4  ;;  %p749_p9 = pneg %p748_p3 }
  0x3f   : > { %v325_v6 = vmul.f32 %v637_v3, %v324_v5  ;;  %p754_p13 = pnand %p753_p12, %p749_p9 }
  0x41   : > { %v326_v7 = vadd.f32 %v637_v3, %v325_v6 }
  0x43   : > { %v328_v8 = vsel %vm327_vm1, %v637_v3, %v326_v7 }
  0xa8   : > { %v321_v9 = vpop.xlane.xlu0 %320 }
  0xa9   : > { %v329_v10 = vmul.f32 %v328_v8, %v321_v9 }
  0xab   : > { %v330_v11 = vsub.f32 %v317_v0, %v329_v10 }
  0xad   : > { %v331_v12 = vmul.f32 %v330_v11, %v330_v11 }
  0xaf   : > { %v332_v13 = vsel %vm318_vm0, %v331_v12, 0.0 }
  0xb0   : > { %333 = vadd.xlane.f32.xlu0 %v332_v13 }
 0x123   : > { %v334_v18 = vpop.xlane.xlu0 %333 }
 0x124   : > { %v335_v19 = vmul.f32 %v334_v18, %v328_v8 }
 0x126   : > { %v336_v20 = vadd.f32 1e-06, %v335_v19 }
 0x128   : > { %638 = vrsqrt.f32 %v336_v20  ;;  %vm343_vm3 = vweird.f32 %v336_v20 }
 0x12e   : > { %v639_v21 = vpop.eup %638 }
 0x12f   : > { %v338_v22 = vmul.f32 %v639_v21, %v336_v20  ;;  %vm344_vm2 = vweird.f32 %v639_v21 }
 0x130   : > { %vm345_vm4 = vmor %vm343_vm3, %vm344_vm2 }
 0x131   : > { %v339_v23 = vmul.f32 %v639_v21, %v338_v22 }
 0x133   : > { %v340_v25 = vmul.f32 0.5, %v339_v23 }
 0x135   : > { %v341_v27 = vsub.f32 1.5, %v340_v25 }
 0x137   : > { %v342_v28 = vmul.f32 %v639_v21, %v341_v27 }
 0x139   : > { %v346_v30 = vsel %vm345_vm4, %v639_v21, %v342_v28 }
 0x13a   : > { %v347_v31 = vmul.f32 %v346_v30, %v330_v11 }
 0x13c   : > { %v351_v33 = vmul.f32 %v350_v29, %v347_v31 }
 0x13e   : > { %v353_v34 = vadd.f32 %v352_v32, %v351_v33 }
 0x140   : > { %549 = vmatmul.msk.f32.vlgmr.msra.gmra.mxu0 %vm318_vm0, %v353_v34 }
 0x1bd   : > { %v382_v36 = vpop.f32.mrf.mxu0 }
 0x1be   : > { %v383_v37 = vadd.f32 %v635_v35, %v382_v36 }
 0x1c0   : > { %385 = vst [vmem:[%s313_s27] sm:$0xff] %v383_v37 }
 0x1c1   : > { %757 = shalt.err (!%p754_p13)
}
 0x1c2   : > { %562 = dma.vmem_to_hbm [thread:$0]  (%p922_p4), %s402_s28, 128, %s404_s29, %s387_s30  }
 0x1c3 PF: > { %s1039_s7 = sld [smem:[#allocation13_spill]]  ;;  %p576_p0 = pnand %p539_p6, %p930_p7 }
 0x1c5   : > { %p577_p2 = pneg %p576_p0 }
 0x1c9   : > { %s415_s15 = sand.u32 1, %s1039_s7  }
 0x1ca   : > { %s416_s17 = scalar_lea.sflag [#allocation4], %s415_s15 }
 0x1cb   : > { %795 = dma.done.wait (%p577_p2), %s416_s17, 128  }
 0x1cc   : > { %797 = vsyncadd (%p577_p2), %s416_s17, 4294967168  ;;  %s23_s20 = sadd.s32 1, %s820_s20   ;;  %s1041_s25 = sld [smem:[#allocation14_spill]] }
 0x1cd   : > { %p20_p5 = scmp.ge.s32.totalorder %s23_s20, 4   ;;  %s1042_s17 = sld [smem:[#allocation16_spill]] }
 0x1ce   : > { %s1043_s10 = sld [smem:[#allocation15_spill]]  ;;  %s1044_s15 = smov %s804_s16 }
 0x1cf   : > { %s1046_s18 = smov %s816_s19 }
 0x1d0   :  { %22 = sbr.rel (!%p20_p5) target bundleno = 10 (0xa), region = 102 }
 0x1d2   : > { %s1045_s16 = smov %s1041_s25 }
 0x1d4   : > { %s1047_s19 = smov %s1043_s10 }
 0x1d5   :  { %422 = vsyncpa [#allocation3], 1 }
 0x1d6   :  { %424 = vsyncpa [#allocation3 + $0x1], 1 }
 0x1d7   :  { %425 = vsyncpa [#allocation6], 1 }
 0x1d8   :  { %427 = vsyncpa [#allocation6 + $0x1], 1 }
 0x1d9   :  { %428 = vsyncpa [#allocation4], 1 }
 0x1da   :  { %430 = vsyncpa [#allocation4 + $0x1], 1 }

</bundles_post_ra>
